<compile_context>
chip_gen: v7x
topology: tpu7x:2x2x1
jax: 0.10.0
libtpu: 0.0.40
codegen_flags: <defaults>
</compile_context>

<pallas_src>
import functools

import jax
import jax.numpy as jnp
from jax.experimental import pallas as pl
from jax.experimental.pallas import tpu as pltpu

LANE = 128


def _round_up(x: int, m: int) -> int:
    return (x + m - 1) // m * m


def _vmem_capacity_bytes() -> int:
    """Per-core VMEM capacity; conservative 64 MiB (v7x) fallback if unqueryable."""
    try:
        info_fn = getattr(pltpu, "get_tpu_info", None)
        if info_fn is not None:
            cap = int(getattr(info_fn(), "vmem_capacity_bytes", 0) or 0)
            if cap > 0:
                return max(32 << 20, min(cap, 192 << 20))
    except Exception:
        pass
    return 64 << 20


def _pick_epilogue_dtype(compute_dtype):
    """bf16 bias+tanh epilogue only on chips with a bf16 VPU/EUP (v6e/v7x)."""
    if jnp.dtype(compute_dtype).itemsize != 2:
        return jnp.float32
    try:
        kind = jax.devices()[0].device_kind.lower()
    except Exception:
        return jnp.float32
    if "v6" in kind or "v7" in kind:
        return jnp.dtype(compute_dtype)
    return jnp.float32  # v5e and older: no bf16 VPU/EUP


def _head_kernel(x_ref, w1_ref, b1_ref, w2_ref, b2_ref, o_ref, *, n_sub, epi_dtype):
    """Fused dense -> tanh -> out_proj for one batch tile (weights VMEM-resident)."""
    w1 = w1_ref[...]
    b1 = b1_ref[...]          # already cast to epi_dtype in the wrapper
    w2 = w2_ref[...]
    b2 = b2_ref[...]          # f32
    sub = x_ref.shape[0] // n_sub
    # Independent sub-tiles so the MXU of sub-tile s+1 can overlap the EUP of sub-tile s.
    for s in range(n_sub):
        xs = x_ref[...] if n_sub == 1 else x_ref[s * sub:(s + 1) * sub, :]
        h = jnp.dot(xs, w1, preferred_element_type=jnp.float32)
        h = jnp.tanh(h.astype(epi_dtype) + b1)
        o = jnp.dot(h.astype(w2.dtype), w2, preferred_element_type=jnp.float32)
        res = (o + b2).astype(o_ref.dtype)
        if n_sub == 1:
            o_ref[...] = res
        else:
            o_ref[s * sub:(s + 1) * sub, :] = res


def _head_kernel_ktiled(x_ref, w1_ref, b1_ref, w2_ref, b2_ref, o_ref, acc_ref,
                        *, epi_dtype):
    """Fallback when resident weights exceed VMEM: d_in is a reduction grid axis;
    the first matmul accumulates into an f32 VMEM scratch."""
    k = pl.program_id(1)

    @pl.when(k == 0)
    def _init():
        acc_ref[...] = jnp.zeros_like(acc_ref)

    acc_ref[...] += jnp.dot(x_ref[...], w1_ref[...],
                            preferred_element_type=jnp.float32)

    @pl.when(k == pl.num_programs(1) - 1)
    def _finalize():
        h = jnp.tanh(acc_ref[...].astype(epi_dtype) + b1_ref[...])
        o = jnp.dot(h.astype(w2_ref.dtype), w2_ref[...],
                    preferred_element_type=jnp.float32)
        o_ref[...] = (o + b2_ref[...]).astype(o_ref.dtype)


@functools.partial(jax.jit, static_argnames=("compute_dtype",))
def bart_classification_head(x, w1, b1, w2, b2, compute_dtype=jnp.bfloat16):
    """x:  [B, input_dim]
       w1: [input_dim, inner_dim]   (transposed vs. PyTorch nn.Linear's [out, in])
       b1: [inner_dim]
       w2: [inner_dim, num_classes]
       b2: [num_classes]
       returns [B, num_classes] in x.dtype (f32 MXU accumulation throughout)."""
    B, d_in = x.shape
    inner = w1.shape[1]
    n_classes = w2.shape[1]

    out_dtype = x.dtype
    out_bytes = jnp.dtype(out_dtype).itemsize
    cb = jnp.dtype(compute_dtype).itemsize
    sublane = 16 if cb == 2 else 8

    epi_dtype = _pick_epilogue_dtype(compute_dtype)
    epi_bytes = jnp.dtype(epi_dtype).itemsize

    # ---- generation-aware VMEM budget --------------------------------------------
    cap = _vmem_capacity_bytes()                     # 64 MiB (v7x) / 128 MiB (v5e, v6e)
    budget = (cap * 3) // 4                          # ~48 MiB / ~96 MiB
    vmem_limit = int(min(cap - (4 << 20), budget + (16 << 20)))

    # ---- lane-dense out_proj: pad class dim to a multiple of 128 -------------------
    c_pad = _round_up(max(n_classes, LANE), LANE)

    # ---- cast weights/activations; b1 in epilogue dtype, b2 in f32 -----------------
    x_c = x.astype(compute_dtype)
    w1_c = w1.astype(compute_dtype)
    b1_2d = b1.astype(epi_dtype).reshape(1, inner)
    w2_pad = jnp.zeros((inner, c_pad), compute_dtype).at[:, :n_classes].set(
        w2.astype(compute_dtype))
    b2_pad = jnp.zeros((1, c_pad), jnp.float32).at[0, :n_classes].set(
        b2.astype(jnp.float32))

    # ---- batch tile: largest tile fitting the budget, but with enough grid steps ---
    # ---- for DMA/compute overlap (2 on single-core chips, 4 on v7x megacore) -------
    weight_resident = ((d_in * inner + inner * c_pad) * cb      # single-buffered weights
                       + inner * epi_bytes + c_pad * 4)         # biases

    target_steps = 4 if cap <= (96 << 20) else 2
    max_tile = 2048 if cb == 2 else 1024
    tile_cap = max(sublane, _round_up(-(-B // target_steps), sublane))
    tile_b = max(sublane, min(max_tile, tile_cap, _round_up(B, sublane)))

    def _main_fits(tile):
        stream = 2 * tile * (d_in * cb + c_pad * out_bytes)     # double-buffered x / out
        temps = tile * inner * (4 + cb) + tile * c_pad * 4      # f32 h + recast + f32 o
        return weight_resident + stream + temps <= budget

    while tile_b > sublane and not _main_fits(tile_b):
        tile_b = max(sublane, _round_up(tile_b // 2, sublane))

    if _main_fits(tile_b):
        # -------- main path: weights fully VMEM-resident, batch streams ------------
        n_batch = pl.cdiv(B, tile_b)
        n_sub = 2 if (tile_b >= 256 and tile_b % (2 * sublane) == 0) else 1
        kernel = functools.partial(_head_kernel, n_sub=n_sub, epi_dtype=epi_dtype)
        out_padded = pl.pallas_call(
            kernel,
            out_shape=jax.ShapeDtypeStruct((B, c_pad), out_dtype),
            grid_spec=pltpu.PrefetchScalarGridSpec(
                num_scalar_prefetch=0,
                grid=(n_batch,),
                in_specs=[
                    pl.BlockSpec((tile_b, d_in), lambda i: (i, 0)),     # streamed x
                    pl.BlockSpec((d_in, inner), lambda i: (0, 0),
                                 pipeline_mode=pl.Buffered(1)),          # resident w1
                    pl.BlockSpec((1, inner), lambda i: (0, 0),
                                 pipeline_mode=pl.Buffered(1)),          # resident b1
                    pl.BlockSpec((inner, c_pad), lambda i: (0, 0),
                                 pipeline_mode=pl.Buffered(1)),          # resident w2
                    pl.BlockSpec((1, c_pad), lambda i: (0, 0),
                                 pipeline_mode=pl.Buffered(1)),          # resident b2
                ],
                out_specs=pl.BlockSpec((tile_b, c_pad), lambda i: (i, 0)),
            ),
            compiler_params=pltpu.CompilerParams(
                dimension_semantics=("parallel",),
                vmem_limit_bytes=vmem_limit,
            ),
        )(x_c, w1_c, b1_2d, w2_pad, b2_pad)
        return out_padded[:, :n_classes]

    # -------- fallback: resident weights too large -> tile d_in as a reduction ------
    tile_b = max(sublane, min(tile_b, 512))

    def _k_fits(tile, tk):
        resident = inner * c_pad * cb + inner * epi_bytes + c_pad * 4
        stream = 2 * tile * tk * cb + 2 * tk * inner * cb + 2 * tile * c_pad * out_bytes
        temps = tile * inner * (4 + cb) + tile * c_pad * 4
        return resident + stream + temps <= budget

    tk = _round_up(d_in, LANE)
    while tk > LANE and not _k_fits(tile_b, tk):
        tk = _round_up(-(-tk // 2), LANE)
    while tile_b > sublane and not _k_fits(tile_b, tk):
        tile_b = max(sublane, _round_up(tile_b // 2, sublane))

    d_pad = _round_up(d_in, tk)
    if d_pad != d_in:  # zero-pad the contraction dim only (zeros contribute nothing)
        x_c = jnp.pad(x_c, ((0, 0), (0, d_pad - d_in)))
        w1_c = jnp.pad(w1_c, ((0, d_pad - d_in), (0, 0)))

    n_batch = pl.cdiv(B, tile_b)
    n_k = d_pad // tk
    kernel = functools.partial(_head_kernel_ktiled, epi_dtype=epi_dtype)
    out_padded = pl.pallas_call(
        kernel,
        out_shape=jax.ShapeDtypeStruct((B, c_pad), out_dtype),
        grid_spec=pltpu.PrefetchScalarGridSpec(
            num_scalar_prefetch=0,
            grid=(n_batch, n_k),
            in_specs=[
                pl.BlockSpec((tile_b, tk), lambda i, k: (i, k)),        # streamed x
                pl.BlockSpec((tk, inner), lambda i, k: (k, 0)),         # streamed w1
                pl.BlockSpec((1, inner), lambda i, k: (0, 0),
                             pipeline_mode=pl.Buffered(1)),
                pl.BlockSpec((inner, c_pad), lambda i, k: (0, 0),
                             pipeline_mode=pl.Buffered(1)),
                pl.BlockSpec((1, c_pad), lambda i, k: (0, 0),
                             pipeline_mode=pl.Buffered(1)),
            ],
            out_specs=pl.BlockSpec((tile_b, c_pad), lambda i, k: (i, 0)),
            scratch_shapes=[pltpu.VMEM((tile_b, inner), jnp.float32)],
        ),
        compiler_params=pltpu.CompilerParams(
            dimension_semantics=("parallel", "arbitrary"),
            vmem_limit_bytes=vmem_limit,
        ),
    )(x_c, w1_c, b1_2d, w2_pad, b2_pad)
    return out_padded[:, :n_classes]


def init_params(key, input_dim, inner_dim, num_classes, dtype=jnp.float32):
    """Deterministic init mirroring nn.Linear defaults: U(-1/sqrt(fan_in), 1/sqrt(fan_in))."""
    k1, k2, k3, k4 = jax.random.split(key, 4)
    bound1 = 1.0 / (input_dim ** 0.5)
    bound2 = 1.0 / (inner_dim ** 0.5)
    w1 = jax.random.uniform(k1, (input_dim, inner_dim), dtype, -bound1, bound1)
    b1 = jax.random.uniform(k2, (inner_dim,), dtype, -bound1, bound1)
    w2 = jax.random.uniform(k3, (inner_dim, num_classes), dtype, -bound2, bound2)
    b2 = jax.random.uniform(k4, (num_classes,), dtype, -bound2, bound2)
    return w1, b1, w2, b2


def _reference(x, w1, b1, w2, b2, compute_dtype=jnp.bfloat16):
    """Pure-JAX reference mirroring the kernel's compute path (bf16 dots, f32 accum,
    generation-matched epilogue dtype)."""
    epi = _pick_epilogue_dtype(compute_dtype)
    h = jnp.dot(x.astype(compute_dtype), w1.astype(compute_dtype),
                preferred_element_type=jnp.float32)
    h = jnp.tanh(h.astype(epi) + b1.astype(epi))
    o = jnp.dot(h.astype(compute_dtype), w2.astype(compute_dtype),
                preferred_element_type=jnp.float32)
    return (o + b2.astype(jnp.float32)).astype(x.dtype)


if __name__ == "__main__":
    key = jax.random.PRNGKey(0)

    # Case 1: tiny head.
    batch, input_dim, inner_dim, num_classes = 2, 32, 32, 4
    kx, kp, key = jax.random.split(key, 3)
    x = jax.random.normal(kx, (batch, input_dim), jnp.float32)
    w1, b1, w2, b2 = init_params(kp, input_dim, inner_dim, num_classes)
    out = jax.block_until_ready(bart_classification_head(x, w1, b1, w2, b2))
    assert out.shape == (batch, num_classes)
    ref = _reference(x, w1, b1, w2, b2)
    assert jnp.allclose(out, ref, atol=3e-2, rtol=3e-2), (out, ref)
    ref_f32 = jnp.tanh(x @ w1 + b1) @ w2 + b2          # loose: bf16 rounding of x/w
    assert jnp.allclose(out, ref_f32, atol=7e-2, rtol=7e-2), (out, ref_f32)

    # Case 2: ragged batch (B not a multiple of the tile) exercises the masked
    # edge-block path that replaced the wrapper-side batch pad.
    batch, input_dim, inner_dim, num_classes = 20, 64, 96, 5
    kx, kp = jax.random.split(key)
    x = jax.random.normal(kx, (batch, input_dim), jnp.float32)
    w1, b1, w2, b2 = init_params(kp, input_dim, inner_dim, num_classes)
    out = jax.block_until_ready(bart_classification_head(x, w1, b1, w2, b2))
    assert out.shape == (batch, num_classes)
    ref = _reference(x, w1, b1, w2, b2)
    assert jnp.allclose(out, ref, atol=3e-2, rtol=3e-2), (out, ref)

    print("KERNEL_OK")
</pallas_src>

<mosaic_0001>
module attributes {stable_mosaic.version = 11 : i64} {
  func.func @_head_kernel(%arg0: i32, %arg1: memref<16x32xbf16, #tpu.memory_space<vmem>>, %arg2: memref<32x32xbf16, #tpu.memory_space<vmem>>, %arg3: memref<1x32xf32, #tpu.memory_space<vmem>>, %arg4: memref<32x128xbf16, #tpu.memory_space<vmem>>, %arg5: memref<1x128xf32, #tpu.memory_space<vmem>>, %arg6: memref<16x128xf32, #tpu.memory_space<vmem>>) attributes {dimension_semantics = [#tpu.dimension_semantics<parallel>], iteration_bounds = array<i64: 1>, scalar_prefetch = 0 : i64, scratch_operands = 0 : i64, tpu.core_type = #tpu.core_type<tc>, window_params = [{transform_indices = @transform_0, window_bounds = array<i64: 16, 32>}, {pipeline_mode = #tpu.pipeline_mode<synchronous>, transform_indices = @transform_1, window_bounds = array<i64: 32, 32>}, {pipeline_mode = #tpu.pipeline_mode<synchronous>, transform_indices = @transform_2, window_bounds = array<i64: 1, 32>}, {pipeline_mode = #tpu.pipeline_mode<synchronous>, transform_indices = @transform_3, window_bounds = array<i64: 32, 128>}, {pipeline_mode = #tpu.pipeline_mode<synchronous>, transform_indices = @transform_4, window_bounds = array<i64: 1, 128>}, {transform_indices = @transform_5, window_bounds = array<i64: 16, 128>}]} {
    %c0 = arith.constant 0 : index
    %c0_0 = arith.constant 0 : index
    %0 = vector.load %arg2[%c0, %c0_0] : memref<32x32xbf16, #tpu.memory_space<vmem>>, vector<32x32xbf16>
    %c0_1 = arith.constant 0 : index
    %c0_2 = arith.constant 0 : index
    %1 = vector.load %arg3[%c0_1, %c0_2] : memref<1x32xf32, #tpu.memory_space<vmem>>, vector<1x32xf32>
    %c0_3 = arith.constant 0 : index
    %c0_4 = arith.constant 0 : index
    %2 = vector.load %arg4[%c0_3, %c0_4] : memref<32x128xbf16, #tpu.memory_space<vmem>>, vector<32x128xbf16>
    %c0_5 = arith.constant 0 : index
    %c0_6 = arith.constant 0 : index
    %3 = vector.load %arg5[%c0_5, %c0_6] : memref<1x128xf32, #tpu.memory_space<vmem>>, vector<1x128xf32>
    %c0_7 = arith.constant 0 : index
    %c0_8 = arith.constant 0 : index
    %4 = vector.load %arg1[%c0_7, %c0_8] : memref<16x32xbf16, #tpu.memory_space<vmem>>, vector<16x32xbf16>
    %cst = arith.constant dense<0.000000e+00> : vector<16x32xf32>
    %5 = tpu.matmul %4, %0, %cst {dimension_numbers = #tpu.dot_dimension_numbers<[1], [0], [0], [1], [0, 0, 1, 1], [], []>} : vector<16x32xbf16>, vector<32x32xbf16>, vector<16x32xf32> -> vector<16x32xf32>
    %6 = vector.broadcast %1 : vector<1x32xf32> to vector<16x32xf32>
    %7 = arith.addf %5, %6 : vector<16x32xf32>
    %8 = math.tanh %7 : vector<16x32xf32>
    %9 = arith.truncf %8 : vector<16x32xf32> to vector<16x32xbf16>
    %cst_9 = arith.constant dense<0.000000e+00> : vector<16x128xf32>
    %10 = tpu.matmul %9, %2, %cst_9 {dimension_numbers = #tpu.dot_dimension_numbers<[1], [0], [0], [1], [0, 0, 1, 1], [], []>} : vector<16x32xbf16>, vector<32x128xbf16>, vector<16x128xf32> -> vector<16x128xf32>
    %11 = vector.broadcast %3 : vector<1x128xf32> to vector<16x128xf32>
    %12 = arith.addf %10, %11 : vector<16x128xf32>
    %c0_10 = arith.constant 0 : index
    %c0_11 = arith.constant 0 : index
    %13 = vector.load %arg6[%c0_10, %c0_11] : memref<16x128xf32, #tpu.memory_space<vmem>>, vector<16x128xf32>
    tpu.vector_store %arg6[%c0_10, %c0_11], %12 {strides = array<i32>} : memref<16x128xf32, #tpu.memory_space<vmem>>, vector<16x128xf32>,
    return
  }
  func.func @transform_0(%arg0: i32) -> (i32, i32) {
    %c0_i32 = arith.constant 0 : i32
    %c0_i32_0 = arith.constant 0 : i32
    return %arg0, %c0_i32 : i32, i32
  }
  func.func @transform_1(%arg0: i32) -> (i32, i32) {
    %c0_i32 = arith.constant 0 : i32
    %c0_i32_0 = arith.constant 0 : i32
    %c0_i32_1 = arith.constant 0 : i32
    return %c0_i32, %c0_i32_0 : i32, i32
  }
  func.func @transform_2(%arg0: i32) -> (i32, i32) {
    %c0_i32 = arith.constant 0 : i32
    %c0_i32_0 = arith.constant 0 : i32
    %c0_i32_1 = arith.constant 0 : i32
    return %c0_i32, %c0_i32_0 : i32, i32
  }
  func.func @transform_3(%arg0: i32) -> (i32, i32) {
    %c0_i32 = arith.constant 0 : i32
    %c0_i32_0 = arith.constant 0 : i32
    %c0_i32_1 = arith.constant 0 : i32
    return %c0_i32, %c0_i32_0 : i32, i32
  }
  func.func @transform_4(%arg0: i32) -> (i32, i32) {
    %c0_i32 = arith.constant 0 : i32
    %c0_i32_0 = arith.constant 0 : i32
    %c0_i32_1 = arith.constant 0 : i32
    return %c0_i32, %c0_i32_0 : i32, i32
  }
  func.func @transform_5(%arg0: i32) -> (i32, i32) {
    %c0_i32 = arith.constant 0 : i32
    %c0_i32_0 = arith.constant 0 : i32
    return %arg0, %c0_i32 : i32, i32
  }
}

</mosaic_0001>

<bundles_post_ra>
// kernel: bart_classification_head.1
= control target key start
LH: loop header
LB: loop body
LE: loop exit
PB: predicated region body
PF: predicated region fallthrough
CT: control target
= control target key end

     0   :  { %10 = vsyncpa [#allocation3], 0  ;;  %v311_v1 = vmov 0.0   ;;  %v61_v3 = vlaneseq  ;;  %vm312_vm0 = vmmov 0   ;;  %v313_v12 = vmov 1966171168   ;;  %s403_s0 = inlined_call_operand.vmem [shape: bf16[2,32], index: 0, kind: input, shape index: {}]   ;;  %s404_s1 = inlined_call_operand.vmem [shape: bf16[32,32], index: 1, kind: input, shape index: {}]   ;;  %s405_s2 = inlined_call_operand.vmem [shape: f32[1,32], index: 2, kind: input, shape index: {}]   ;;  %s406_s3 = inlined_call_operand.vmem [shape: bf16[32,128], index: 3, kind: input, shape index: {}]   ;;  %s407_s4 = inlined_call_operand.vmem [shape: f32[1,128], index: 4, kind: input, shape index: {}]   ;;  %s408_s5 = inlined_call_operand.hbm [shape: f32[2,128], index: 5, kind: output, shape index: {}]  }
   0x1   :  { %v279_v0 = vld [vmem:[%s404_s1] sm:$0xff]   ;;  %257 = vmatprep.subr.bf16.mxu0 %v311_v1  ;;  %265 = vmatprep.subr.bf16.mxu1 %v311_v1  ;;  %v280_v2 = vld [vmem:[%s404_s1 + $0x8] sm:$0xff]   ;;  %v59_v13 = vunpack.c.l.s4 %v313_v12  ;;  %vm115_vm1 = vcmask 261120  }
   0x2   :  { %258 = vmatpush3.bf16.msra.mxu0 %v279_v0  ;;  %261 = vmatprep.mubr.msk.bf16.mxu0 %vm312_vm0, %v311_v1  ;;  %v32_v4 = vld [vmem:[%s403_s0] sm:$0x1]  ;;  %v33_v5 = vld [vmem:[%s403_s0 + $0x1] sm:$0x1]  ;;  %v34_v6 = vld [vmem:[%s403_s0 + $0x2] sm:$0x1] }
   0x3   :  { %259 = vmatprep.subr.bf16.mxu0 %v311_v1  ;;  %v35_v7 = vld [vmem:[%s403_s0 + $0x3] sm:$0x1]  ;;  %v36_v8 = vld [vmem:[%s403_s0 + $0x4] sm:$0x1]  ;;  %v37_v9 = vld [vmem:[%s403_s0 + $0x5] sm:$0x1]  ;;  %269 = vmatprep.mubr.msk.bf16.mxu1 %vm312_vm0, %v311_v1  ;;  %v54_v15 = vcombine.low %v32_v4, %v33_v5  ;;  %v60_v19 = vunpack.c.0.s8 %v59_v13 }
   0x4   :  { %v38_v10 = vld [vmem:[%s403_s0 + $0x6] sm:$0x1]  ;;  %v39_v11 = vld [vmem:[%s403_s0 + $0x7] sm:$0x1]  ;;  %v62_v14 = vshrl.u32 %v61_v3, 7  ;;  %v55_v16 = vcombine.low %v34_v6, %v35_v7  ;;  %v56_v17 = vcombine.low %v36_v8, %v37_v9  ;;  %v282_v31 = vld [vmem:[%s406_s3 + $0x8] sm:$0xff]  }
   0x5   :  { %v57_v18 = vcombine.low %v38_v10, %v39_v11  ;;  %v281_v30 = vld [vmem:[%s406_s3] sm:$0xff]  }
   0x6   :  { %260 = vmatpush3.bf16.msra.mxu0 %v280_v2  ;;  %v63_v20 = vsub.s32 %v60_v19, %v62_v14  ;;  %266 = vmatpush3.bf16.msra.mxu1 %v281_v30  ;;  %v243_v32 = vld [vmem:[%s405_s2] ss:$0 sm:$0xff] }
   0x7   :  { %267 = vmatprep.subr.bf16.mxu1 %v311_v1  ;;  %v247_v42 = vld [vmem:[%s407_s4] ss:$0 sm:$0xff] }
   0x8   :  { %v64_v21 = vrot.slane %v54_v15, %v63_v20  ;;  %v71_v22 = vrot.slane %v55_v16, %v63_v20  ;;  %v78_v23 = vrot.slane %v56_v17, %v63_v20  ;;  %v85_v24 = vrot.slane %v57_v18, %v63_v20 }
   0xa   :  { %v86_v25 = vcombine.low %v64_v21, %v71_v22  ;;  %v87_v26 = vcombine.low %v78_v23, %v85_v24  ;;  %268 = vmatpush3.bf16.msra.mxu1 %v282_v31 }
   0xc   :  { %v94_v27 = vrot.slane %v86_v25, %v63_v20  ;;  %v101_v28 = vrot.slane %v87_v26, %v63_v20 }
   0xe   :  { %v102_v29 = vcombine.low %v94_v27, %v101_v28 }
  0x10   :  { %262 = vmatmul.mubr.msk.bf16.vlgmr.msra.gmra.mrb[0].mxu0 %vm115_vm1, %v102_v29 }
  0xe3   :  { %v153_v33 = vpop.f32.mrb[0].mxu0 }
  0xe4   :  { %v154_v34 = vadd.f32 %v243_v32, %v153_v33  ;;  %v263_v35 = vpop.f32.mrb[1].mxu0 }
  0xe5   :  { %v156_v36 = vpop.f32.mrb[2].mxu0 }
  0xe6   :  { %v157_v37 = vadd.f32 %v243_v32, %v156_v36  ;;  %v264_v38 = vpop.f32.mrb[3].mxu0  ;;  %283 = vtanh.f32 %v154_v34 }
  0xe8   :  { %285 = vtanh.f32 %v157_v37 }
  0xf0   :  { %v284_v39 = vpop.eup %283 }
  0xf2   :  { %v286_v40 = vpop.eup %285 }
  0xf3   :  { %v162_v41 = vpack.c.bf16 %v286_v40, %v284_v39 }
  0xf5   :  { %270 = vmatmul.mubr.msk.bf16.vlgmr.msra.gmra.mrb[0].mxu1 %vm115_vm1, %v162_v41 }
 0x1c8   :  { %v218_v43 = vpop.f32.mrb[0].mxu1 }
 0x1c9   :  { %v219_v44 = vadd.f32 %v247_v42, %v218_v43  ;;  %v271_v45 = vpop.f32.mrb[1].mxu1 }
 0x1ca   :  { %v221_v46 = vpop.f32.mrb[2].mxu1 }
 0x1cb   :  { %225 = vst [vmem:[#allocation2] sm:$0xff] %v219_v44  ;;  %v222_v47 = vadd.f32 %v247_v42, %v221_v46  ;;  %v272_v48 = vpop.f32.mrb[3].mxu1 }
 0x1cd   :  { %226 = vst [vmem:[#allocation2 + $0x8] sm:$0xff] %v222_v47 }
 0x1ce   :  { %231 = vsyncadd [#allocation3], 224  ;;  %s314_s2 = smov [#allocation2]  }
 0x1cf   :  { %s232_s18 = sshll.u32 %s314_s2, 4  ;;  %s233_s18 = int_to_ptr.vmem [resolvable:$true] %s232_s18 }
 0x1d0   :  { %s287_s19 = scalar_lea.vmem %s233_s18, 32  ;;  %s291_s20 = scalar_lea.vmem %s233_s18, 256 }
 0x1d1   :  { %p288_p0 = scmp.ne.s32.totalorder %s233_s18, %s287_s19  ;;  %p292_p1 = scmp.lt.s32.totalorder %s233_s18, %s233_s18 }
 0x1d2   :  { %p293_p2 = scmp.lt.s32.totalorder %s291_s20, %s287_s19 }
 0x1d4   :  { %p294_p3 = por %p293_p2, %p292_p1 }
 0x1d6   :  { %p295_p4 = pnand %p294_p3, %p288_p0 }
 0x1d8   :  { %298 = shalt.err (!%p295_p4)
}
 0x1d9   :  { %s299_s22 = scalar_lea.hbm %s408_s5, 32 }
 0x1da   :  { %p300_p5 = scmp.ne.s32.totalorder %s408_s5, %s299_s22  ;;  %p303_p6 = scmp.lt.u32.totalorder %s299_s22, %s408_s5 }
 0x1dc   :  { %p305_p7 = pnand %p303_p6, %p300_p5 }
 0x1de   :  { %308 = shalt.err (!%p305_p7)
}
 0x1df   :  { %s315_s27 = smov 32   ;;  %s316_s28 = smov 2  }
 0x1e0   :  { %238 = dma.vmem_to_hbm [thread:$0]  %s233_s18, 32, %s408_s5, [#allocation3], %s315_s27, %s315_s27, %s316_s28  }
 0x1e1   :  { %309 = dma.done.wait [#allocation3], 256  }
 0x1e2   :  { %310 = vsyncadd [#allocation3], 4294967040 }
 0x1e3   :  { %242 = vsyncpa [#allocation3], 1 }

</bundles_post_ra>
